<compile_context>
chip_gen: v6e
topology: v6e:2x2x1
jax: 0.10.0
libtpu: 0.0.40
codegen_flags: <defaults>
</compile_context>

<pallas_src>
import functools

import jax
import jax.numpy as jnp
from jax.experimental import pallas as pl
from jax.experimental.pallas import tpu as pltpu


def fnnc_kernel(x_ref, s_ref, y_ref, w1_ref, b1_ref, w2_ref, b2_ref, wd_ref, bd_ref,
                out_ref, *, n_valid):
    # Zero the per-split accumulator on the first tile of this split's stream.
    @pl.when(pl.program_id(1) == 0)
    def _init():
        out_ref[...] = jnp.zeros_like(out_ref)

    # --- MLP hot path: bf16 MXU matmuls on lane-packed rows, f32 accumulation ---
    x = x_ref[...]                                                     # [Tp, P*D] bf16
    h1 = jnp.dot(x, w1_ref[...], preferred_element_type=jnp.float32) + b1_ref[...]
    h1 = jnp.maximum(h1, 0.0)                                          # [Tp, P*H0] f32
    h2 = jnp.dot(h1.astype(jnp.bfloat16), w2_ref[...],
                 preferred_element_type=jnp.float32) + b2_ref[...]
    h2 = jnp.maximum(h2, 0.0)                                          # [Tp, P*H1] f32

    # 2-class head folded to a logit difference (ld = logit1 - logit0), bf16 inputs.
    ld = jnp.dot(h2.astype(jnp.bfloat16), wd_ref[...],
                 preferred_element_type=jnp.float32) + bd_ref[...]     # [Tp, P] f32

    # Shared-exp tail: softplus(ld) = -log p0 ; p1 = sigmoid(ld).
    e = jnp.exp(-jnp.abs(ld))
    sp = jnp.maximum(ld, 0.0) + jnp.log(1.0 + e)
    r = 1.0 / (1.0 + e)
    p1 = jnp.where(ld >= 0.0, r, e * r)

    # Validity mask for padded rows, derived from the static batch size.
    tp, pk = ld.shape
    tile = pl.program_id(0) * pl.num_programs(1) + pl.program_id(1)
    base = tile * (tp * pk)
    row = jax.lax.broadcasted_iota(jnp.int32, (tp, pk), 0)
    slot = jax.lax.broadcasted_iota(jnp.int32, (tp, pk), 1)
    valid = (base + row * pk + slot) < n_valid

    # Five partial sums (sublane reductions), accumulated into the resident (5, P)
    # output block.  s / y are zero-padded in the wrapper, so they self-mask.
    zero = jnp.zeros_like(ld)
    sv = s_ref[...]                                                    # [Tp, P] f32
    yv = y_ref[...]                                                    # [Tp, P] f32
    out_ref[0:1, :] += jnp.sum(jnp.where(valid, sp, zero), axis=0, keepdims=True)
    out_ref[1:2, :] += jnp.sum(jnp.where(valid, p1, zero), axis=0, keepdims=True)
    out_ref[2:3, :] += jnp.sum(sv * p1, axis=0, keepdims=True)
    out_ref[3:4, :] += jnp.sum(yv * p1, axis=0, keepdims=True)
    out_ref[4:5, :] += jnp.sum(yv * ld, axis=0, keepdims=True)


def _pack_factor(d):
    """Rows packed into the lane dim so the first contraction is ~128 deep."""
    if d >= 128:
        return 1
    return max(1, min(8, 128 // max(1, d)))


def _num_split():
    """2-way split only on chips with two TensorCores (v7x-class); else 1."""
    try:
        kind = jax.devices()[0].device_kind.lower()
    except Exception:
        return 1
    return 2 if ("v7" in kind or "7x" in kind) else 1


def _pick_packed_tile(n, pack, num_split, max_tp=2048):
    """Packed rows (sublanes) per grid step: multiple of 8, minimizing padding."""
    packed_total = pl.cdiv(n, num_split * pack)      # packed rows per split (ceil)
    if packed_total <= max_tp:
        # One tile per split; at most 8*pack-1 padded rows per split.
        return max(8, pl.cdiv(packed_total, 8) * 8)
    best_tp, best_pad = 64, None
    for tp in range(64, max_tp + 1, 64):
        n_pad = pl.cdiv(n, num_split * tp * pack) * num_split * tp * pack
        if best_pad is None or n_pad < best_pad or (n_pad == best_pad and tp > best_tp):
            best_tp, best_pad = tp, n_pad
    return best_tp


def init_params(key, input_size, hidden=(32, 32), n_out=2):
    """PyTorch nn.Linear-style init, weights stored as [in, out]."""
    dims = [input_size, hidden[0], hidden[1], n_out]
    params = []
    for i in range(3):
        fan_in, fan_out = dims[i], dims[i + 1]
        key, kw, kb = jax.random.split(key, 3)
        bound = 1.0 / jnp.sqrt(jnp.float32(fan_in))
        w = jax.random.uniform(kw, (fan_in, fan_out), jnp.float32, -bound, bound)
        b = jax.random.uniform(kb, (fan_out,), jnp.float32, -bound, bound)
        params += [w, b]
    return tuple(params)


def fnnc_forward_losses(x, y, s, params, gamma=1.0, acc_loss="ce"):
    """Pallas equivalent of FNNC.forward loss computation (no grad/opt step)."""
    if acc_loss not in ("ce", "q_mean"):
        raise Exception('args fnnc_loss_method must in "ce" "q_mean"')

    w1, b1, w2, b2, w3, b3 = params
    n, d = x.shape
    h0, h1d = w1.shape[1], w2.shape[1]

    # Glue matching the PyTorch forward: s = s[:, [1]], y = y.view(-1).long()
    s1 = s[:, 1].astype(jnp.float32)                   # [N]
    yf = y.reshape(-1).astype(jnp.float32)             # [N]

    pack = _pack_factor(d)
    num_split = _num_split()
    tp = _pick_packed_tile(n, pack, num_split)         # packed rows per tile
    rows_per_tile = tp * pack
    n_pad = pl.cdiv(n, num_split * rows_per_tile) * num_split * rows_per_tile
    tps = n_pad // (num_split * rows_per_tile)         # tiles per split

    # Lane-packed bf16 x; zero-padded s / y packed the same way (they self-mask).
    xb = jnp.pad(x.astype(jnp.bfloat16), ((0, n_pad - n), (0, 0)))
    xb = xb.reshape(n_pad // pack, pack * d)
    s_p = jnp.pad(s1, (0, n_pad - n)).reshape(n_pad // pack, pack)
    y_p = jnp.pad(yf, (0, n_pad - n)).reshape(n_pad // pack, pack)

    # Block-diagonal replicated weights (kron(I_P, W)), resident in VMEM.
    eye_p = jnp.eye(pack, dtype=jnp.float32)
    w1_blk = jnp.kron(eye_p, w1.astype(jnp.float32)).astype(jnp.bfloat16)   # [P*D, P*H0]
    w2_blk = jnp.kron(eye_p, w2.astype(jnp.float32)).astype(jnp.bfloat16)   # [P*H0, P*H1]
    wd = (w3[:, 1] - w3[:, 0]).astype(jnp.float32).reshape(h1d, 1)
    wd_blk = jnp.kron(eye_p, wd).astype(jnp.bfloat16)                       # [P*H1, P]
    b1_blk = jnp.tile(b1.astype(jnp.float32), pack).reshape(1, pack * h0)
    b2_blk = jnp.tile(b2.astype(jnp.float32), pack).reshape(1, pack * h1d)
    bd_blk = jnp.full((1, pack), (b3[1] - b3[0]).astype(jnp.float32),
                      dtype=jnp.float32)

    flops = 2 * n_pad * pack * (d * h0 + h0 * h1d + h1d)
    bytes_accessed = (xb.size * 2 + (s_p.size + y_p.size) * 4
                      + (w1_blk.size + w2_blk.size + wd_blk.size) * 2
                      + (b1_blk.size + b2_blk.size + bd_blk.size) * 4
                      + num_split * 5 * pack * 4)

    partials = pl.pallas_call(
        functools.partial(fnnc_kernel, n_valid=n),
        out_shape=jax.ShapeDtypeStruct((num_split, 5, pack), jnp.float32),
        grid=(num_split, tps),
        in_specs=[
            pl.BlockSpec((tp, pack * d),       lambda c, t: (c * tps + t, 0)),  # x
            pl.BlockSpec((tp, pack),           lambda c, t: (c * tps + t, 0)),  # s
            pl.BlockSpec((tp, pack),           lambda c, t: (c * tps + t, 0)),  # y
            pl.BlockSpec((pack * d, pack * h0),   lambda c, t: (0, 0)),         # w1 blk
            pl.BlockSpec((1, pack * h0),          lambda c, t: (0, 0)),         # b1
            pl.BlockSpec((pack * h0, pack * h1d), lambda c, t: (0, 0)),         # w2 blk
            pl.BlockSpec((1, pack * h1d),         lambda c, t: (0, 0)),         # b2
            pl.BlockSpec((pack * h1d, pack),      lambda c, t: (0, 0)),         # wd blk
            pl.BlockSpec((1, pack),               lambda c, t: (0, 0)),         # bd
        ],
        out_specs=pl.BlockSpec((None, 5, pack), lambda c, t: (c, 0, 0)),
        compiler_params=pltpu.CompilerParams(
            dimension_semantics=("parallel", "arbitrary"),
            vmem_limit_bytes=32 * 1024 * 1024,
        ),
        cost_estimate=pl.CostEstimate(
            flops=int(flops), transcendentals=int(2 * n_pad),
            bytes_accessed=int(bytes_accessed)),
    )(xb, s_p, y_p, w1_blk, b1_blk, w2_blk, b2_blk, wd_blk, bd_blk)

    # --- finalize globally (never per tile): reduce split + pack-lane axes ---
    parts = jnp.sum(partials, axis=(0, 2))   # [5]
    sp_sum = parts[0]                        # sum_valid softplus(ld)
    p_sum = parts[1]                         # sum_valid p1
    sp1 = parts[2]                           # sum s * p1
    yp1 = parts[3]                           # sum y * p1
    yld = parts[4]                           # sum y * ld

    nf = jnp.float32(n)
    ce_loss = (sp_sum - yld) / nf            # mean cross entropy

    # Note: single-class batches (sum_s in {0, n} or sum_y in {0, n}) give inf/NaN,
    # same as the PyTorch reference.
    sum_s = jnp.sum(s1)
    c1 = sp1 / sum_s
    c0 = (p_sum - sp1) / (nf - sum_s)
    dp_loss = jnp.abs(c0 - c1)

    if acc_loss == "ce":
        return [ce_loss, gamma * dp_loss]

    sum_y = jnp.sum(yf)
    qa = 1.0 - yp1 / sum_y                   # 1 - sum(p1*y)/sum(y)
    qb = (p_sum - yp1) / (nf - sum_y)        # == 1 - sum(p0*(1-y))/sum(1-y)
    q_mean_loss = jnp.sqrt((qa * qa + qb * qb) / 2.0)
    return [q_mean_loss, gamma * dp_loss]


def ref_losses(x, y, s, params, gamma=1.0, acc_loss="ce"):
    """Pure-JAX reference mirroring the PyTorch forward (matching bf16 roundings)."""
    w1, b1, w2, b2, w3, b3 = params
    f32 = jnp.float32
    xb = x.astype(jnp.bfloat16)
    h1 = jax.nn.relu(jnp.dot(xb, w1.astype(jnp.bfloat16),
                             preferred_element_type=f32) + b1)
    h2 = jax.nn.relu(jnp.dot(h1.astype(jnp.bfloat16), w2.astype(jnp.bfloat16),
                             preferred_element_type=f32) + b2)
    wdb = (w3[:, 1] - w3[:, 0]).astype(jnp.bfloat16).reshape(-1, 1)
    ld = jnp.dot(h2.astype(jnp.bfloat16), wdb,
                 preferred_element_type=f32) + (b3[1] - b3[0])
    # Softmax / CE are shift-invariant: logits [l0, l1] == [0, l1 - l0].
    logits = jnp.concatenate([jnp.zeros_like(ld), ld], axis=1)
    logp = jax.nn.log_softmax(logits, axis=-1)
    ce = -jnp.mean(logp[jnp.arange(x.shape[0]), y])
    p = jax.nn.softmax(logits, axis=-1)
    s1 = s[:, 1:2].astype(f32)
    yfc = y.astype(f32).reshape(-1, 1)
    c0 = jnp.sum(p[:, 1:2] * (1.0 - s1)) / jnp.sum(1.0 - s1)
    c1 = jnp.sum(p[:, 1:2] * s1) / jnp.sum(s1)
    dp = jnp.abs(c0 - c1)
    qa = 1.0 - jnp.sum(p[:, 1:2] * yfc) / jnp.sum(yfc)
    qb = 1.0 - jnp.sum(p[:, 0:1] * (1.0 - yfc)) / jnp.sum(1.0 - yfc)
    qm = jnp.sqrt((qa * qa + qb * qb) / 2.0)
    if acc_loss == "ce":
        return [ce, gamma * dp]
    return [qm, gamma * dp]


if __name__ == "__main__":
    key = jax.random.PRNGKey(0)
    N, input_size = 8, 16

    kx, kp, kbig = jax.random.split(key, 3)
    x = jax.random.normal(kx, (N, input_size), jnp.float32)
    y = jnp.array([0, 1, 1, 0, 1, 0, 0, 1], dtype=jnp.int32)            # labels [N]
    s_col1 = jnp.array([0, 1, 0, 1, 1, 0, 1, 0], dtype=jnp.float32)     # sensitive attr
    s = jnp.stack([1.0 - s_col1, s_col1], axis=1)                       # [N, 2]

    params = init_params(kp, input_size)

    # --- small-batch check, acc_loss='ce' (module default) ---
    got = fnnc_forward_losses(x, y, s, params, gamma=1.0, acc_loss="ce")
    got = [jax.block_until_ready(v) for v in got]
    want = ref_losses(x, y, s, params, gamma=1.0, acc_loss="ce")
    for g, w in zip(got, want):
        assert jnp.allclose(g, w, rtol=2e-3, atol=2e-4), (g, w)

    # --- small-batch check, acc_loss='q_mean' ---
    got_q = fnnc_forward_losses(x, y, s, params, gamma=1.0, acc_loss="q_mean")
    got_q = [jax.block_until_ready(v) for v in got_q]
    want_q = ref_losses(x, y, s, params, gamma=1.0, acc_loss="q_mean")
    for g, w in zip(got_q, want_q):
        assert jnp.allclose(g, w, rtol=2e-3, atol=2e-4), (g, w)

    # --- larger batch: exercises packing, multi-tile accumulation, padding masks ---
    N2 = 9000
    k1, k2, kx2 = jax.random.split(kbig, 3)
    x2 = jax.random.normal(kx2, (N2, input_size), jnp.float32)
    y2 = jax.random.bernoulli(k1, 0.5, (N2,)).astype(jnp.int32)
    s2c = jax.random.bernoulli(k2, 0.5, (N2,)).astype(jnp.float32)
    s2 = jnp.stack([1.0 - s2c, s2c], axis=1)

    got2 = fnnc_forward_losses(x2, y2, s2, params, gamma=1.0, acc_loss="ce")
    got2 = [jax.block_until_ready(v) for v in got2]
    want2 = ref_losses(x2, y2, s2, params, gamma=1.0, acc_loss="ce")
    for g, w in zip(got2, want2):
        assert jnp.allclose(g, w, rtol=2e-3, atol=2e-4), (g, w)

    print("KERNEL_OK")
</pallas_src>

<mosaic_0001>
module attributes {stable_mosaic.version = 11 : i64} {
  func.func @fnnc_kernel(%arg0: i32, %arg1: i32, %arg2: memref<8x128xbf16, #tpu.memory_space<vmem>>, %arg3: memref<8x8xf32, #tpu.memory_space<vmem>>, %arg4: memref<8x8xf32, #tpu.memory_space<vmem>>, %arg5: memref<128x256xbf16, #tpu.memory_space<vmem>>, %arg6: memref<1x256xf32, #tpu.memory_space<vmem>>, %arg7: memref<256x256xbf16, #tpu.memory_space<vmem>>, %arg8: memref<1x256xf32, #tpu.memory_space<vmem>>, %arg9: memref<256x8xbf16, #tpu.memory_space<vmem>>, %arg10: memref<1x8xf32, #tpu.memory_space<vmem>>, %arg11: memref<1x5x8xf32, #tpu.memory_space<vmem>>) attributes {dimension_semantics = [#tpu.dimension_semantics<parallel>, #tpu.dimension_semantics<arbitrary>], iteration_bounds = array<i64: 1, 1>, scalar_prefetch = 0 : i64, scratch_operands = 0 : i64, tpu.core_type = #tpu.core_type<tc>, window_params = [{transform_indices = @transform_0, window_bounds = array<i64: 8, 128>}, {transform_indices = @transform_1, window_bounds = array<i64: 8, 8>}, {transform_indices = @transform_2, window_bounds = array<i64: 8, 8>}, {pipeline_mode = #tpu.pipeline_mode<synchronous>, transform_indices = @transform_3, window_bounds = array<i64: 128, 256>}, {pipeline_mode = #tpu.pipeline_mode<synchronous>, transform_indices = @transform_4, window_bounds = array<i64: 1, 256>}, {pipeline_mode = #tpu.pipeline_mode<synchronous>, transform_indices = @transform_5, window_bounds = array<i64: 256, 256>}, {pipeline_mode = #tpu.pipeline_mode<synchronous>, transform_indices = @transform_6, window_bounds = array<i64: 1, 256>}, {pipeline_mode = #tpu.pipeline_mode<synchronous>, transform_indices = @transform_7, window_bounds = array<i64: 256, 8>}, {pipeline_mode = #tpu.pipeline_mode<synchronous>, transform_indices = @transform_8, window_bounds = array<i64: 1, 8>}, {transform_indices = @transform_9, window_bounds = array<i64: 1, 5, 8>}]} {
    %c0_i32 = arith.constant 0 : i32
    %0 = arith.cmpi eq, %arg1, %c0_i32 : i32
    %1 = arith.extui %0 : i1 to i32
    %c0_i32_0 = arith.constant 0 : i32
    %2 = arith.cmpi ne, %1, %c0_i32_0 : i32
    scf.if %2 {
      %cst_61 = arith.constant 0.000000e+00 : f32
      %103 = vector.broadcast %cst_61 : f32 to vector<5x8xf32>
      %c0_62 = arith.constant 0 : index
      %c0_63 = arith.constant 0 : index
      %c0_64 = arith.constant 0 : index
      %104 = vector.load %arg11[%c0_62, %c0_63, %c0_64] : memref<1x5x8xf32, #tpu.memory_space<vmem>>, vector<1x5x8xf32>
      %105 = vector.shape_cast %104 : vector<1x5x8xf32> to vector<5x8xf32>
      %106 = vector.shape_cast %103 : vector<5x8xf32> to vector<1x5x8xf32>
      tpu.vector_store %arg11[%c0_62, %c0_63, %c0_64], %106 {strides = array<i32>} : memref<1x5x8xf32, #tpu.memory_space<vmem>>, vector<1x5x8xf32>,
    } else {
    }
    %c0 = arith.constant 0 : index
    %c0_1 = arith.constant 0 : index
    %3 = vector.load %arg2[%c0, %c0_1] : memref<8x128xbf16, #tpu.memory_space<vmem>>, vector<8x128xbf16>
    %c0_2 = arith.constant 0 : index
    %c0_3 = arith.constant 0 : index
    %4 = vector.load %arg5[%c0_2, %c0_3] : memref<128x256xbf16, #tpu.memory_space<vmem>>, vector<128x256xbf16>
    %cst = arith.constant dense<0.000000e+00> : vector<8x256xf32>
    %5 = tpu.matmul %3, %4, %cst {dimension_numbers = #tpu.dot_dimension_numbers<[1], [0], [0], [1], [0, 0, 1, 1], [], []>} : vector<8x128xbf16>, vector<128x256xbf16>, vector<8x256xf32> -> vector<8x256xf32>
    %c0_4 = arith.constant 0 : index
    %c0_5 = arith.constant 0 : index
    %6 = vector.load %arg6[%c0_4, %c0_5] : memref<1x256xf32, #tpu.memory_space<vmem>>, vector<1x256xf32>
    %7 = vector.broadcast %6 : vector<1x256xf32> to vector<8x256xf32>
    %8 = arith.addf %5, %7 : vector<8x256xf32>
    %cst_6 = arith.constant 0.000000e+00 : f32
    %9 = vector.broadcast %cst_6 : f32 to vector<8x256xf32>
    %10 = arith.maximumf %8, %9 : vector<8x256xf32>
    %11 = arith.truncf %10 : vector<8x256xf32> to vector<8x256xbf16>
    %c0_7 = arith.constant 0 : index
    %c0_8 = arith.constant 0 : index
    %12 = vector.load %arg7[%c0_7, %c0_8] : memref<256x256xbf16, #tpu.memory_space<vmem>>, vector<256x256xbf16>
    %cst_9 = arith.constant dense<0.000000e+00> : vector<8x256xf32>
    %13 = tpu.matmul %11, %12, %cst_9 {dimension_numbers = #tpu.dot_dimension_numbers<[1], [0], [0], [1], [0, 0, 1, 1], [], []>} : vector<8x256xbf16>, vector<256x256xbf16>, vector<8x256xf32> -> vector<8x256xf32>
    %c0_10 = arith.constant 0 : index
    %c0_11 = arith.constant 0 : index
    %14 = vector.load %arg8[%c0_10, %c0_11] : memref<1x256xf32, #tpu.memory_space<vmem>>, vector<1x256xf32>
    %15 = vector.broadcast %14 : vector<1x256xf32> to vector<8x256xf32>
    %16 = arith.addf %13, %15 : vector<8x256xf32>
    %cst_12 = arith.constant 0.000000e+00 : f32
    %17 = vector.broadcast %cst_12 : f32 to vector<8x256xf32>
    %18 = arith.maximumf %16, %17 : vector<8x256xf32>
    %19 = arith.truncf %18 : vector<8x256xf32> to vector<8x256xbf16>
    %c0_13 = arith.constant 0 : index
    %c0_14 = arith.constant 0 : index
    %20 = vector.load %arg9[%c0_13, %c0_14] : memref<256x8xbf16, #tpu.memory_space<vmem>>, vector<256x8xbf16>
    %cst_15 = arith.constant dense<0.000000e+00> : vector<8x8xf32>
    %21 = tpu.matmul %19, %20, %cst_15 {dimension_numbers = #tpu.dot_dimension_numbers<[1], [0], [0], [1], [0, 0, 1, 1], [], []>} : vector<8x256xbf16>, vector<256x8xbf16>, vector<8x8xf32> -> vector<8x8xf32>
    %c0_16 = arith.constant 0 : index
    %c0_17 = arith.constant 0 : index
    %22 = vector.load %arg10[%c0_16, %c0_17] : memref<1x8xf32, #tpu.memory_space<vmem>>, vector<1x8xf32>
    %23 = vector.broadcast %22 : vector<1x8xf32> to vector<8x8xf32>
    %24 = arith.addf %21, %23 : vector<8x8xf32>
    %25 = math.absf %24 : vector<8x8xf32>
    %cst_18 = arith.constant 0.000000e+00 : f32
    %26 = vector.broadcast %cst_18 : f32 to vector<8x8xf32>
    %27 = arith.subf %26, %25 : vector<8x8xf32>
    %28 = math.exp %27 : vector<8x8xf32>
    %cst_19 = arith.constant 0.000000e+00 : f32
    %29 = vector.broadcast %cst_19 : f32 to vector<8x8xf32>
    %30 = arith.maximumf %24, %29 : vector<8x8xf32>
    %cst_20 = arith.constant 1.000000e+00 : f32
    %31 = vector.broadcast %cst_20 : f32 to vector<8x8xf32>
    %32 = arith.addf %31, %28 : vector<8x8xf32>
    %33 = math.log %32 : vector<8x8xf32>
    %34 = arith.addf %30, %33 : vector<8x8xf32>
    %cst_21 = arith.constant 1.000000e+00 : f32
    %35 = vector.broadcast %cst_21 : f32 to vector<8x8xf32>
    %36 = arith.addf %35, %28 : vector<8x8xf32>
    %cst_22 = arith.constant 1.000000e+00 : f32
    %37 = vector.broadcast %cst_22 : f32 to vector<8x8xf32>
    %38 = arith.divf %37, %36 : vector<8x8xf32>
    %cst_23 = arith.constant 0.000000e+00 : f32
    %39 = vector.broadcast %cst_23 : f32 to vector<8x8xf32>
    %40 = arith.cmpf oge, %24, %39 : vector<8x8xf32>
    %41 = arith.mulf %28, %38 : vector<8x8xf32>
    %42 = arith.select %40, %38, %41 : vector<8x8xi1>, vector<8x8xf32>
    %c1_i32 = arith.constant 1 : i32
    %43 = arith.muli %arg0, %c1_i32 : i32
    %44 = arith.addi %43, %arg1 : i32
    %c64_i32 = arith.constant 64 : i32
    %45 = arith.muli %44, %c64_i32 : i32
    %46 = tpu.iota {dimensions = array<i32: 0>} : vector<8x8xi32>
    %47 = tpu.iota {dimensions = array<i32: 1>} : vector<8x8xi32>
    %c8_i32 = arith.constant 8 : i32
    %48 = vector.broadcast %c8_i32 : i32 to vector<8x8xi32>
    %49 = arith.muli %46, %48 : vector<8x8xi32>
    %50 = vector.broadcast %45 : i32 to vector<8x8xi32>
    %51 = arith.addi %50, %49 : vector<8x8xi32>
    %52 = arith.addi %51, %47 : vector<8x8xi32>
    %c8_i32_24 = arith.constant 8 : i32
    %53 = vector.broadcast %c8_i32_24 : i32 to vector<8x8xi32>
    %54 = arith.cmpi slt, %52, %53 : vector<8x8xi32>
    %cst_25 = arith.constant 0.000000e+00 : f32
    %55 = vector.broadcast %cst_25 : f32 to vector<8x8xf32>
    %c0_26 = arith.constant 0 : index
    %c0_27 = arith.constant 0 : index
    %56 = vector.load %arg3[%c0_26, %c0_27] : memref<8x8xf32, #tpu.memory_space<vmem>>, vector<8x8xf32>
    %c0_28 = arith.constant 0 : index
    %c0_29 = arith.constant 0 : index
    %57 = vector.load %arg4[%c0_28, %c0_29] : memref<8x8xf32, #tpu.memory_space<vmem>>, vector<8x8xf32>
    %c0_30 = arith.constant 0 : index
    %c0_31 = arith.constant 0 : index
    %c0_32 = arith.constant 0 : index
    %58 = vector.load %arg11[%c0_30, %c0_31, %c0_32] : memref<1x5x8xf32, #tpu.memory_space<vmem>>, vector<1x1x8xf32>
    %59 = vector.shape_cast %58 : vector<1x1x8xf32> to vector<1x8xf32>
    %60 = arith.select %54, %34, %55 : vector<8x8xi1>, vector<8x8xf32>
    %cst_33 = arith.constant dense<0.000000e+00> : vector<8xf32>
    %61 = vector.multi_reduction <add>, %60, %cst_33 [0] : vector<8x8xf32> to vector<8xf32>
    %62 = vector.shape_cast %61 : vector<8xf32> to vector<1x8xf32>
    %63 = arith.addf %59, %62 : vector<1x8xf32>
    %c0_34 = arith.constant 0 : index
    %c0_35 = arith.constant 0 : index
    %c0_36 = arith.constant 0 : index
    %64 = vector.load %arg11[%c0_34, %c0_35, %c0_36] : memref<1x5x8xf32, #tpu.memory_space<vmem>>, vector<1x1x8xf32>
    %65 = vector.shape_cast %64 : vector<1x1x8xf32> to vector<1x8xf32>
    %66 = vector.shape_cast %63 : vector<1x8xf32> to vector<1x1x8xf32>
    tpu.vector_store %arg11[%c0_34, %c0_35, %c0_36], %66 {strides = array<i32>} : memref<1x5x8xf32, #tpu.memory_space<vmem>>, vector<1x1x8xf32>,
    %c0_37 = arith.constant 0 : index
    %c1 = arith.constant 1 : index
    %c0_38 = arith.constant 0 : index
    %67 = vector.load %arg11[%c0_37, %c1, %c0_38] : memref<1x5x8xf32, #tpu.memory_space<vmem>>, vector<1x1x8xf32>
    %68 = vector.shape_cast %67 : vector<1x1x8xf32> to vector<1x8xf32>
    %69 = arith.select %54, %42, %55 : vector<8x8xi1>, vector<8x8xf32>
    %cst_39 = arith.constant dense<0.000000e+00> : vector<8xf32>
    %70 = vector.multi_reduction <add>, %69, %cst_39 [0] : vector<8x8xf32> to vector<8xf32>
    %71 = vector.shape_cast %70 : vector<8xf32> to vector<1x8xf32>
    %72 = arith.addf %68, %71 : vector<1x8xf32>
    %c0_40 = arith.constant 0 : index
    %c1_41 = arith.constant 1 : index
    %c0_42 = arith.constant 0 : index
    %73 = vector.load %arg11[%c0_40, %c1_41, %c0_42] : memref<1x5x8xf32, #tpu.memory_space<vmem>>, vector<1x1x8xf32>
    %74 = vector.shape_cast %73 : vector<1x1x8xf32> to vector<1x8xf32>
    %75 = vector.shape_cast %72 : vector<1x8xf32> to vector<1x1x8xf32>
    tpu.vector_store %arg11[%c0_40, %c1_41, %c0_42], %75 {strides = array<i32>} : memref<1x5x8xf32, #tpu.memory_space<vmem>>, vector<1x1x8xf32>,
    %c0_43 = arith.constant 0 : index
    %c2 = arith.constant 2 : index
    %c0_44 = arith.constant 0 : index
    %76 = vector.load %arg11[%c0_43, %c2, %c0_44] : memref<1x5x8xf32, #tpu.memory_space<vmem>>, vector<1x1x8xf32>
    %77 = vector.shape_cast %76 : vector<1x1x8xf32> to vector<1x8xf32>
    %78 = arith.mulf %56, %42 : vector<8x8xf32>
    %cst_45 = arith.constant dense<0.000000e+00> : vector<8xf32>
    %79 = vector.multi_reduction <add>, %78, %cst_45 [0] : vector<8x8xf32> to vector<8xf32>
    %80 = vector.shape_cast %79 : vector<8xf32> to vector<1x8xf32>
    %81 = arith.addf %77, %80 : vector<1x8xf32>
    %c0_46 = arith.constant 0 : index
    %c2_47 = arith.constant 2 : index
    %c0_48 = arith.constant 0 : index
    %82 = vector.load %arg11[%c0_46, %c2_47, %c0_48] : memref<1x5x8xf32, #tpu.memory_space<vmem>>, vector<1x1x8xf32>
    %83 = vector.shape_cast %82 : vector<1x1x8xf32> to vector<1x8xf32>
    %84 = vector.shape_cast %81 : vector<1x8xf32> to vector<1x1x8xf32>
    tpu.vector_store %arg11[%c0_46, %c2_47, %c0_48], %84 {strides = array<i32>} : memref<1x5x8xf32, #tpu.memory_space<vmem>>, vector<1x1x8xf32>,
    %c0_49 = arith.constant 0 : index
    %c3 = arith.constant 3 : index
    %c0_50 = arith.constant 0 : index
    %85 = vector.load %arg11[%c0_49, %c3, %c0_50] : memref<1x5x8xf32, #tpu.memory_space<vmem>>, vector<1x1x8xf32>
    %86 = vector.shape_cast %85 : vector<1x1x8xf32> to vector<1x8xf32>
    %87 = arith.mulf %57, %42 : vector<8x8xf32>
    %cst_51 = arith.constant dense<0.000000e+00> : vector<8xf32>
    %88 = vector.multi_reduction <add>, %87, %cst_51 [0] : vector<8x8xf32> to vector<8xf32>
    %89 = vector.shape_cast %88 : vector<8xf32> to vector<1x8xf32>
    %90 = arith.addf %86, %89 : vector<1x8xf32>
    %c0_52 = arith.constant 0 : index
    %c3_53 = arith.constant 3 : index
    %c0_54 = arith.constant 0 : index
    %91 = vector.load %arg11[%c0_52, %c3_53, %c0_54] : memref<1x5x8xf32, #tpu.memory_space<vmem>>, vector<1x1x8xf32>
    %92 = vector.shape_cast %91 : vector<1x1x8xf32> to vector<1x8xf32>
    %93 = vector.shape_cast %90 : vector<1x8xf32> to vector<1x1x8xf32>
    tpu.vector_store %arg11[%c0_52, %c3_53, %c0_54], %93 {strides = array<i32>} : memref<1x5x8xf32, #tpu.memory_space<vmem>>, vector<1x1x8xf32>,
    %c0_55 = arith.constant 0 : index
    %c4 = arith.constant 4 : index
    %c0_56 = arith.constant 0 : index
    %94 = vector.load %arg11[%c0_55, %c4, %c0_56] : memref<1x5x8xf32, #tpu.memory_space<vmem>>, vector<1x1x8xf32>
    %95 = vector.shape_cast %94 : vector<1x1x8xf32> to vector<1x8xf32>
    %96 = arith.mulf %57, %24 : vector<8x8xf32>
    %cst_57 = arith.constant dense<0.000000e+00> : vector<8xf32>
    %97 = vector.multi_reduction <add>, %96, %cst_57 [0] : vector<8x8xf32> to vector<8xf32>
    %98 = vector.shape_cast %97 : vector<8xf32> to vector<1x8xf32>
    %99 = arith.addf %95, %98 : vector<1x8xf32>
    %c0_58 = arith.constant 0 : index
    %c4_59 = arith.constant 4 : index
    %c0_60 = arith.constant 0 : index
    %100 = vector.load %arg11[%c0_58, %c4_59, %c0_60] : memref<1x5x8xf32, #tpu.memory_space<vmem>>, vector<1x1x8xf32>
    %101 = vector.shape_cast %100 : vector<1x1x8xf32> to vector<1x8xf32>
    %102 = vector.shape_cast %99 : vector<1x8xf32> to vector<1x1x8xf32>
    tpu.vector_store %arg11[%c0_58, %c4_59, %c0_60], %102 {strides = array<i32>} : memref<1x5x8xf32, #tpu.memory_space<vmem>>, vector<1x1x8xf32>,
    return
  }
  func.func @transform_0(%arg0: i32, %arg1: i32) -> (i32, i32) {
    %c1_i32 = arith.constant 1 : i32
    %0 = arith.muli %arg0, %c1_i32 : i32
    %1 = arith.addi %0, %arg1 : i32
    %c0_i32 = arith.constant 0 : i32
    %c0_i32_0 = arith.constant 0 : i32
    return %1, %c0_i32 : i32, i32
  }
  func.func @transform_1(%arg0: i32, %arg1: i32) -> (i32, i32) {
    %c1_i32 = arith.constant 1 : i32
    %0 = arith.muli %arg0, %c1_i32 : i32
    %1 = arith.addi %0, %arg1 : i32
    %c0_i32 = arith.constant 0 : i32
    %c0_i32_0 = arith.constant 0 : i32
    return %1, %c0_i32 : i32, i32
  }
  func.func @transform_2(%arg0: i32, %arg1: i32) -> (i32, i32) {
    %c1_i32 = arith.constant 1 : i32
    %0 = arith.muli %arg0, %c1_i32 : i32
    %1 = arith.addi %0, %arg1 : i32
    %c0_i32 = arith.constant 0 : i32
    %c0_i32_0 = arith.constant 0 : i32
    return %1, %c0_i32 : i32, i32
  }
  func.func @transform_3(%arg0: i32, %arg1: i32) -> (i32, i32) {
    %c0_i32 = arith.constant 0 : i32
    %c0_i32_0 = arith.constant 0 : i32
    %c0_i32_1 = arith.constant 0 : i32
    return %c0_i32, %c0_i32_0 : i32, i32
  }
  func.func @transform_4(%arg0: i32, %arg1: i32) -> (i32, i32) {
    %c0_i32 = arith.constant 0 : i32
    %c0_i32_0 = arith.constant 0 : i32
    %c0_i32_1 = arith.constant 0 : i32
    return %c0_i32, %c0_i32_0 : i32, i32
  }
  func.func @transform_5(%arg0: i32, %arg1: i32) -> (i32, i32) {
    %c0_i32 = arith.constant 0 : i32
    %c0_i32_0 = arith.constant 0 : i32
    %c0_i32_1 = arith.constant 0 : i32
    return %c0_i32, %c0_i32_0 : i32, i32
  }
  func.func @transform_6(%arg0: i32, %arg1: i32) -> (i32, i32) {
    %c0_i32 = arith.constant 0 : i32
    %c0_i32_0 = arith.constant 0 : i32
    %c0_i32_1 = arith.constant 0 : i32
    return %c0_i32, %c0_i32_0 : i32, i32
  }
  func.func @transform_7(%arg0: i32, %arg1: i32) -> (i32, i32) {
    %c0_i32 = arith.constant 0 : i32
    %c0_i32_0 = arith.constant 0 : i32
    %c0_i32_1 = arith.constant 0 : i32
    return %c0_i32, %c0_i32_0 : i32, i32
  }
  func.func @transform_8(%arg0: i32, %arg1: i32) -> (i32, i32) {
    %c0_i32 = arith.constant 0 : i32
    %c0_i32_0 = arith.constant 0 : i32
    %c0_i32_1 = arith.constant 0 : i32
    return %c0_i32, %c0_i32_0 : i32, i32
  }
  func.func @transform_9(%arg0: i32, %arg1: i32) -> (i32, i32, i32) {
    %c0_i32 = arith.constant 0 : i32
    %c0_i32_0 = arith.constant 0 : i32
    %c0_i32_1 = arith.constant 0 : i32
    return %arg0, %c0_i32, %c0_i32_0 : i32, i32, i32
  }
}

</mosaic_0001>

<bundles_post_ra>
// kernel: tpu_custom_call.1
= control target key start
LH: loop header
LB: loop body
LE: loop exit
PB: predicated region body
PF: predicated region fallthrough
CT: control target
= control target key end

     0   :  { %14 = vsyncpa [#allocation3], 0  ;;  %s1307_s0 = inlined_call_operand.vmem [shape: bf16[8,128], index: 0, kind: input, shape index: {}]   ;;  %s1308_s1 = inlined_call_operand.vmem [shape: f32[8,8], index: 1, kind: input, shape index: {}]   ;;  %s1309_s2 = inlined_call_operand.hbm [shape: f32[8,8], index: 2, kind: input, shape index: {}]   ;;  %s1310_s3 = inlined_call_operand.vmem [shape: bf16[128,256], index: 3, kind: input, shape index: {}]   ;;  %s1311_s4 = inlined_call_operand.hbm [shape: f32[1,256], index: 4, kind: input, shape index: {}]   ;;  %s1312_s5 = inlined_call_operand.hbm [shape: bf16[256,256], index: 5, kind: input, shape index: {}]   ;;  %s1313_s6 = inlined_call_operand.hbm [shape: f32[1,256], index: 6, kind: input, shape index: {}]   ;;  %s1314_s7 = inlined_call_operand.vmem [shape: bf16[256,8], index: 7, kind: input, shape index: {}]   ;;  %s1315_s8 = inlined_call_operand.vmem [shape: f32[1,8], index: 8, kind: input, shape index: {}]   ;;  %s1316_s9 = inlined_call_operand.vmem [shape: f32[1,5,8], index: 9, kind: output, shape index: {}]  }
   0x1   :  { %15 = vsyncpa [#allocation5], 0 }
   0x2   :  { %16 = vsyncpa [#allocation8], 0  ;;  %s1082_s30 = smov [#allocation4]   ;;  %s1083_s11 = smov [#allocation2]  }
   0x3   :  { %s54_s10 = sshll.u32 %s1082_s30, 4  ;;  %s42_s12 = sshll.u32 %s1083_s11, 4  ;;  %s55_s10 = int_to_ptr.vmem [resolvable:$true] %s54_s10  ;;  %s43_s12 = int_to_ptr.vmem [resolvable:$true] %s42_s12 }
   0x4   :  { %s1004_s13 = scalar_lea.vmem %s55_s10, 32  ;;  %p1009_p1 = scmp.lt.s32.totalorder %s55_s10, %s55_s10 }
   0x5   :  { %p1005_p0 = scmp.ne.s32.totalorder %s55_s10, %s1004_s13  ;;  %p1010_p2 = scmp.lt.s32.totalorder %s1004_s13, %s1004_s13 }
   0x7   :  { %p1011_p3 = por %p1010_p2, %p1009_p1 }
   0x9   :  { %p1012_p4 = pnand %p1011_p3, %p1005_p0 }
   0xb   :  { %1015 = shalt.err (!%p1012_p4)
}
   0xc   :  { %57 = dma.hbm_to_vmem [thread:$0]  %s1311_s4, 32, %s55_s10, [#allocation5]  }
   0xd   :  { %s1024_s16 = scalar_lea.vmem %s43_s12, 128  ;;  %p1029_p6 = scmp.lt.s32.totalorder %s43_s12, %s43_s12 }
   0xe   :  { %p1025_p5 = scmp.ne.s32.totalorder %s43_s12, %s1024_s16  ;;  %p1030_p7 = scmp.lt.s32.totalorder %s1024_s16, %s1024_s16 }
  0x10   :  { %p1031_p8 = por %p1030_p7, %p1029_p6 }
  0x12   :  { %p1032_p9 = pnand %p1031_p8, %p1025_p5 }
  0x14   :  { %1035 = shalt.err (!%p1032_p9)
}
  0x15   :  { %45 = dma.hbm_to_vmem [thread:$0]  %s1309_s2, 128, %s43_s12, [#allocation3]  }
  0x16   :  { %s1084_s19 = smov [#allocation6]  }
  0x17   :  { %s63_s20 = sshll.u32 %s1084_s19, 4  ;;  %s64_s20 = int_to_ptr.vmem [resolvable:$true] %s63_s20 }
  0x18   :  { %s1044_s21 = scalar_lea.vmem %s64_s20, 4096  ;;  %p1049_p11 = scmp.lt.s32.totalorder %s64_s20, %s64_s20 }
  0x19   :  { %p1045_p10 = scmp.ne.s32.totalorder %s64_s20, %s1044_s21  ;;  %p1050_p12 = scmp.lt.s32.totalorder %s1044_s21, %s1044_s21 }
  0x1b   :  { %p1051_p13 = por %p1050_p12, %p1049_p11 }
  0x1d   :  { %p1052_p0 = pnand %p1051_p13, %p1045_p10 }
  0x1f   :  { %1055 = shalt.err (!%p1052_p0)
}
  0x20   :  { %s1085_s4 = smov 128   ;;  %s1086_s22 = smov 8  }
  0x21   :  { %69 = dma.hbm_to_vmem [thread:$0]  %s1312_s5, 4096, %s64_s20, [#allocation5], %s1085_s4, %s1085_s4, %s1086_s22  }
  0x22   :  { %s1087_s25 = smov [#allocation7]  }
  0x23   :  { %s76_s26 = sshll.u32 %s1087_s25, 4  ;;  %s77_s26 = int_to_ptr.vmem [resolvable:$true] %s76_s26 }
  0x24   :  { %s1064_s2 = scalar_lea.vmem %s77_s26, 32  ;;  %p1069_p2 = scmp.lt.s32.totalorder %s77_s26, %s77_s26 }
  0x25   :  { %p1065_p1 = scmp.ne.s32.totalorder %s77_s26, %s1064_s2  ;;  %p1070_p3 = scmp.lt.s32.totalorder %s1064_s2, %s1064_s2 }
  0x27   :  { %p1071_p4 = por %p1070_p3, %p1069_p2 }
  0x29   :  { %p1072_p5 = pnand %p1071_p4, %p1065_p1 }
  0x2b   :  { %1075 = shalt.err (!%p1072_p5)
}
  0x2c   :  { %79 = dma.hbm_to_vmem [thread:$0]  %s1313_s6, 32, %s77_s26, [#allocation8]  }
  0x2d   :  { %1076 = dma.done.wait [#allocation3], 128  }
  0x2e   :  { %1077 = vsyncadd [#allocation3], 4294967168 }
  0x2f   :  { %1078 = dma.done.wait [#allocation5], 4128  }
  0x30   :  { %1079 = vsyncadd [#allocation5], 4294963168 }
  0x31   :  { %1080 = dma.done.wait [#allocation8], 32  }
  0x32   :  { %1081 = vsyncadd [#allocation8], 4294967264  ;;  %v1088_v0 = vmov 0   ;;  %v902_v1 = vld [vmem:[%s1310_s3 + $0x74] ss:$8 sps:$4 sm:$0xff]   ;;  %v978_v54 = vld [vmem:[%s1314_s7 + $0x68] sm:$0xff]   ;;  %v145_v62 = vlaneseq }
  0x33   :  { %267 = vmatprep.mubr.bf16.mxu0 %v1088_v0  ;;  %v904_v2 = vld [vmem:[%s1310_s3 + $0x70] ss:$8 sps:$4 sm:$0xff]   ;;  %235 = vmatprep.subr.bf16.mxu0 %v902_v1  ;;  %v905_v3 = vld [vmem:[%s1310_s3 + $0x64] ss:$8 sps:$4 sm:$0xff]   ;;  %v907_v4 = vld [vmem:[%s1310_s3 + $0x60] ss:$8 sps:$4 sm:$0xff]  }
  0x34   :  { %236 = vmatpush1.bf16.msra.mxu0 %v904_v2  ;;  %v908_v5 = vld [vmem:[%s1310_s3 + $0x54] ss:$8 sps:$4 sm:$0xff]   ;;  %v910_v6 = vld [vmem:[%s1310_s3 + $0x50] ss:$8 sps:$4 sm:$0xff]   ;;  %v911_v7 = vld [vmem:[%s1310_s3 + $0x44] ss:$8 sps:$4 sm:$0xff]  }
  0x35   :  { %237 = vmatprep.subr.bf16.mxu0 %v905_v3  ;;  %v913_v8 = vld [vmem:[%s1310_s3 + $0x40] ss:$8 sps:$4 sm:$0xff]   ;;  %v914_v9 = vld [vmem:[%s1310_s3 + $0x34] ss:$8 sps:$4 sm:$0xff]   ;;  %v916_v13 = vld [vmem:[%s1310_s3 + $0x30] ss:$8 sps:$4 sm:$0xff]  }
  0x36   :  { %v926_v10 = vld [vmem:[#allocation6 + $0x74] ss:$8 sps:$4 sm:$0xff]   ;;  %v928_v11 = vld [vmem:[#allocation6 + $0x70] ss:$8 sps:$4 sm:$0xff]   ;;  %v929_v12 = vld [vmem:[#allocation6 + $0x64] ss:$8 sps:$4 sm:$0xff]  }
  0x37   :  { %484 = vmatprep.subr.bf16.mxu1 %v926_v10  ;;  %v931_v14 = vld [vmem:[#allocation6 + $0x60] ss:$8 sps:$4 sm:$0xff]   ;;  %v932_v15 = vld [vmem:[#allocation6 + $0x54] ss:$8 sps:$4 sm:$0xff]   ;;  %v934_v18 = vld [vmem:[#allocation6 + $0x50] ss:$8 sps:$4 sm:$0xff]  }
  0x38   :  { %238 = vmatpush1.bf16.msra.mxu0 %v907_v4  ;;  %485 = vmatpush1.bf16.msra.mxu1 %v928_v11  ;;  %v917_v16 = vld [vmem:[%s1310_s3 + $0x24] ss:$8 sps:$4 sm:$0xff]   ;;  %v919_v17 = vld [vmem:[%s1310_s3 + $0x20] ss:$8 sps:$4 sm:$0xff]   ;;  %v920_v20 = vld [vmem:[%s1310_s3 + $0x14] ss:$8 sps:$4 sm:$0xff]  }
  0x39   :  { %239 = vmatprep.subr.bf16.mxu0 %v908_v5  ;;  %486 = vmatprep.subr.bf16.mxu1 %v929_v12  ;;  %v935_v19 = vld [vmem:[#allocation6 + $0x44] ss:$8 sps:$4 sm:$0xff]   ;;  %v937_v22 = vld [vmem:[#allocation6 + $0x40] ss:$8 sps:$4 sm:$0xff]   ;;  %v938_v23 = vld [vmem:[#allocation6 + $0x34] ss:$8 sps:$4 sm:$0xff]  }
  0x3a   :  { %v922_v21 = vld [vmem:[%s1310_s3 + $0x10] ss:$8 sps:$4 sm:$0xff]   ;;  %v923_v24 = vld [vmem:[%s1310_s3 + $0x4] ss:$8 sps:$4 sm:$0xff]   ;;  %v925_v25 = vld [vmem:[%s1310_s3] ss:$8 sps:$4 sm:$0xff]  }
  0x3b   :  { %v940_v26 = vld [vmem:[#allocation6 + $0x30] ss:$8 sps:$4 sm:$0xff]   ;;  %v941_v27 = vld [vmem:[#allocation6 + $0x24] ss:$8 sps:$4 sm:$0xff]   ;;  %v943_v29 = vld [vmem:[#allocation6 + $0x20] ss:$8 sps:$4 sm:$0xff]  }
  0x3c   :  { %240 = vmatpush1.bf16.msra.mxu0 %v910_v6  ;;  %487 = vmatpush1.bf16.msra.mxu1 %v931_v14  ;;  %v126_v28 = vld [vmem:[%s1307_s0] sm:$0xf]  ;;  %v947_v32 = vld [vmem:[#allocation6 + $0x4] ss:$8 sps:$4 sm:$0xff]   ;;  %v949_v33 = vld [vmem:[#allocation6] ss:$8 sps:$4 sm:$0xff]  }
  0x3d   :  { %241 = vmatprep.subr.bf16.mxu0 %v911_v7  ;;  %488 = vmatprep.subr.bf16.mxu1 %v932_v15  ;;  %v944_v30 = vld [vmem:[#allocation6 + $0x14] ss:$8 sps:$4 sm:$0xff]   ;;  %v946_v31 = vld [vmem:[#allocation6 + $0x10] ss:$8 sps:$4 sm:$0xff]   ;;  %v953_v36 = vld [vmem:[#allocation6 + $0xe4] ss:$8 sps:$4 sm:$0xff]  }
  0x3e   :  { %v950_v34 = vld [vmem:[#allocation6 + $0xf4] ss:$8 sps:$4 sm:$0xff]   ;;  %v952_v35 = vld [vmem:[#allocation6 + $0xf0] ss:$8 sps:$4 sm:$0xff]   ;;  %v955_v37 = vld [vmem:[#allocation6 + $0xe0] ss:$8 sps:$4 sm:$0xff]  }
  0x3f   :  { %v956_v38 = vld [vmem:[#allocation6 + $0xd4] ss:$8 sps:$4 sm:$0xff]   ;;  %v958_v39 = vld [vmem:[#allocation6 + $0xd0] ss:$8 sps:$4 sm:$0xff]   ;;  %v959_v40 = vld [vmem:[#allocation6 + $0xc4] ss:$8 sps:$4 sm:$0xff]  }
  0x40   :  { %242 = vmatpush1.bf16.msra.mxu0 %v913_v8  ;;  %489 = vmatpush1.bf16.msra.mxu1 %v934_v18  ;;  %v961_v41 = vld [vmem:[#allocation6 + $0xc0] ss:$8 sps:$4 sm:$0xff]   ;;  %v962_v42 = vld [vmem:[#allocation6 + $0xb4] ss:$8 sps:$4 sm:$0xff]   ;;  %v964_v43 = vld [vmem:[#allocation6 + $0xb0] ss:$8 sps:$4 sm:$0xff]  }
  0x41   :  { %243 = vmatprep.subr.bf16.mxu0 %v914_v9  ;;  %490 = vmatprep.subr.bf16.mxu1 %v935_v19  ;;  %v965_v44 = vld [vmem:[#allocation6 + $0xa4] ss:$8 sps:$4 sm:$0xff]   ;;  %v967_v45 = vld [vmem:[#allocation6 + $0xa0] ss:$8 sps:$4 sm:$0xff]   ;;  %v968_v46 = vld [vmem:[#allocation6 + $0x94] ss:$8 sps:$4 sm:$0xff]  }
  0x42   :  { %v970_v47 = vld [vmem:[#allocation6 + $0x90] ss:$8 sps:$4 sm:$0xff]   ;;  %v971_v48 = vld [vmem:[#allocation6 + $0x84] ss:$8 sps:$4 sm:$0xff]   ;;  %v973_v49 = vld [vmem:[#allocation6 + $0x80] ss:$8 sps:$4 sm:$0xff]  }
  0x43   :  { %v974_v50 = vld [vmem:[%s1314_s7 + $0x78] sm:$0xff]   ;;  %v976_v52 = vld [vmem:[%s1314_s7 + $0x70] sm:$0xff]   ;;  %v979_v55 = vld [vmem:[%s1314_s7 + $0x28] sm:$0xff]   ;;  %v1240_v63 = vshrl.u32 %v145_v62, 7  ;;  %vm124_vm0 = vcmask 61440   ;;  %vm733_vm1 = vcmask 64512  }
  0x44   :  { %244 = vmatpush1.bf16.msra.mxu0 %v916_v13  ;;  %491 = vmatpush1.bf16.msra.mxu1 %v937_v22  ;;  %v975_v51 = vld [vmem:[%s1314_s7 + $0x38] sm:$0xff]   ;;  %v977_v53 = vld [vmem:[%s1314_s7 + $0x30] sm:$0xff]   ;;  %v980_v56 = vld [vmem:[%s1314_s7 + $0x60] sm:$0xff]   ;;  %vm742_vm2 = vcmask 57344  }
  0x45   :  { %245 = vmatprep.subr.bf16.mxu0 %v917_v16  ;;  %492 = vmatprep.subr.bf16.mxu1 %v938_v23  ;;  %v981_v57 = vld [vmem:[%s1314_s7 + $0x20] sm:$0xff]   ;;  %v982_v58 = vld [vmem:[%s1314_s7 + $0x58] sm:$0xff]   ;;  %v984_v60 = vld [vmem:[%s1314_s7 + $0x50] sm:$0xff]   ;;  %v147_v0 = vsub.s32 0, %v1240_v63  ;;  %v151_v2 = vsub.s32 1, %v1240_v63 }
  0x46   :  { %v983_v59 = vld [vmem:[%s1314_s7 + $0x18] sm:$0xff]   ;;  %v985_v61 = vld [vmem:[%s1314_s7 + $0x10] sm:$0xff]   ;;  %v143_v1 = vld [vmem:[#allocation4] sm:$0x3] }
  0x47   :  { %v148_v3 = vrot.slane %v143_v1, %v147_v0  ;;  %v152_v4 = vrot.slane %v143_v1, %v151_v2  ;;  %v986_v15 = vld [vmem:[%s1314_s7 + $0x48] sm:$0xff]   ;;  %v989_v18 = vld [vmem:[%s1314_s7] sm:$0xff]  }
  0x48   :  { %246 = vmatpush1.bf16.msra.mxu0 %v919_v17  ;;  %493 = vmatpush1.bf16.msra.mxu1 %v940_v26  ;;  %v987_v16 = vld [vmem:[%s1314_s7 + $0x8] sm:$0xff]   ;;  %v988_v17 = vld [vmem:[%s1314_s7 + $0x40] sm:$0xff]  }
  0x49   :  { %247 = vmatprep.subr.bf16.mxu0 %v920_v20  ;;  %494 = vmatprep.subr.bf16.mxu1 %v941_v27  ;;  %v312_v19 = vld [vmem:[#allocation7] sm:$0x3] }
  0x4a   :  { %v317_v20 = vrot.slane %v312_v19, %v147_v0 }
  0x4c   :  { %248 = vmatpush1.bf16.msra.mxu0 %v922_v21  ;;  %495 = vmatpush1.bf16.msra.mxu1 %v943_v29  ;;  %v321_v21 = vrot.slane %v312_v19, %v151_v2  ;;  %v729_v2 = vld [vmem:[%s1308_s1] sm:$0xff] }
  0x4d   :  { %249 = vmatprep.subr.bf16.mxu0 %v923_v24  ;;  %496 = vmatprep.subr.bf16.mxu1 %v944_v30 }
  0x50   :  { %250 = vmatpush1.bf16.msra.mxu0 %v925_v25  ;;  %497 = vmatpush1.bf16.msra.mxu1 %v946_v31 }
  0x51   :  { %498 = vmatprep.subr.bf16.mxu1 %v947_v32  ;;  %872 = vmatprep.subr.bf16.mxu0 %v974_v50  ;;  %v1089_v32 = vmov 0.0  }
  0x52   :  { %125 = vst.msk [vmem:[%s1316_s9] sm:$0x1f] %vm124_vm0, %v1089_v32 }
  0x53   :  { %268 = vmatmul.mubr.bf16.vlgmr.msra.gmra.mxu0 %v126_v28 }
  0x54   :  { %499 = vmatpush1.bf16.msra.mxu1 %v949_v33  ;;  %873 = vmatpush3.bf16.msra.mxu0 %v975_v51 }
  0x55   :  { %500 = vmatprep.subr.bf16.mxu1 %v950_v34  ;;  %874 = vmatprep.subr.bf16.mxu0 %v976_v52  ;;  %v855_v34 = vld [vmem:[%s1315_s8] ss:$0 sm:$0xff] }
  0x58   :  { %501 = vmatpush2.bf16.msra.mxu1 %v952_v35  ;;  %875 = vmatpush3.bf16.msra.mxu0 %v977_v53 }
  0x59   :  { %502 = vmatprep.subr.bf16.mxu1 %v953_v36  ;;  %876 = vmatprep.subr.bf16.mxu0 %v978_v54  ;;  %v777_v51 = vld [vmem:[%s1316_s9 + $0x4] sm:$0x1] }
  0x5c   :  { %503 = vmatpush2.bf16.msra.mxu1 %v955_v37  ;;  %877 = vmatpush3.bf16.msra.mxu0 %v979_v55  ;;  %v730_v37 = vld [vmem:[#allocation2] sm:$0xff] }
  0x5d   :  { %504 = vmatprep.subr.bf16.mxu1 %v956_v38  ;;  %878 = vmatprep.subr.bf16.mxu0 %v980_v56  ;;  %v723_v56 = vand.u32 127, %v145_v62 }
  0x60   :  { %505 = vmatpush2.bf16.msra.mxu1 %v958_v39  ;;  %879 = vmatpush3.bf16.msra.mxu0 %v981_v57  ;;  %v724_v57 = vmul.u32 8, %v1240_v63 }
  0x61   :  { %506 = vmatprep.subr.bf16.mxu1 %v959_v40  ;;  %880 = vmatprep.subr.bf16.mxu0 %v982_v58 }
  0x62   :  { %v727_v58 = vadd.s32 %v724_v57, %v723_v56 }
  0x64   :  { %507 = vmatpush2.bf16.msra.mxu1 %v961_v41  ;;  %881 = vmatpush3.bf16.msra.mxu0 %v983_v59  ;;  %vm728_vm3 = vcmp.lt.s32.totalorder %v727_v58, 8 }
  0x65   :  { %508 = vmatprep.subr.bf16.mxu1 %v962_v42  ;;  %882 = vmatprep.subr.bf16.mxu0 %v984_v60 }
  0x68   :  { %509 = vmatpush2.bf16.msra.mxu1 %v964_v43  ;;  %883 = vmatpush3.bf16.msra.mxu0 %v985_v61 }
  0x69   :  { %510 = vmatprep.subr.bf16.mxu1 %v965_v44  ;;  %884 = vmatprep.subr.bf16.mxu0 %v986_v15 }
  0x6c   :  { %511 = vmatpush2.bf16.msra.mxu1 %v967_v45  ;;  %885 = vmatpush3.bf16.msra.mxu0 %v987_v16 }
  0x6d   :  { %512 = vmatprep.subr.bf16.mxu1 %v968_v46  ;;  %886 = vmatprep.subr.bf16.mxu0 %v988_v17 }
  0x70   :  { %513 = vmatpush2.bf16.msra.mxu1 %v970_v47  ;;  %887 = vmatpush3.bf16.msra.mxu0 %v989_v18 }
  0x71   :  { %514 = vmatprep.subr.bf16.mxu1 %v971_v48 }
  0x74   :  { %515 = vmatpush2.bf16.msra.mxu1 %v973_v49 }
 0x113   :  { %v269_v5 = vpop.f32.mrf.mxu0 }
 0x114   :  { %v270_v6 = vadd.f32 %v269_v5, %v148_v3 }
 0x115   :  { %v271_v7 = vpop.f32.mrf.mxu0 }
 0x116   :  { %v272_v8 = vadd.f32 %v271_v7, %v152_v4  ;;  %v276_v9 = vmax.f32 %v270_v6, 0.0 }
 0x117   :  { %v273_v10 = vpop.f32.mrf.mxu0 }
 0x118   :  { %v277_v11 = vmax.f32 %v272_v8, 0.0  ;;  %v278_v14 = vpack.c.bf16 %v276_v9, %v276_v9 }
 0x119   :  { %v274_v12 = vpop.f32.mrf.mxu0 }
 0x11a   :  { %v279_v13 = vpack.c.bf16 %v277_v11, %v277_v11 }
 0x11c   :  { %516 = vmatprep.mubr.bf16.mxu1 %v279_v13 }
 0x11d   :  { %517 = vmatmul.mubr.bf16.vlgmr.msra.gmra.mxu1 %v278_v14 }
 0x1dd   :  { %v518_v22 = vpop.f32.mrf.mxu1 }
 0x1de   :  { %v519_v23 = vadd.f32 %v518_v22, %v317_v20 }
 0x1df   :  { %v520_v24 = vpop.f32.mrf.mxu1 }
 0x1e0   :  { %v521_v25 = vadd.f32 %v520_v24, %v321_v21  ;;  %v525_v26 = vmax.f32 %v519_v23, 0.0 }
 0x1e1   :  { %v522_v27 = vpop.f32.mrf.mxu1 }
 0x1e2   :  { %v526_v28 = vmax.f32 %v521_v25, 0.0  ;;  %v527_v31 = vpack.c.bf16 %v525_v26, %v525_v26 }
 0x1e3   :  { %v523_v29 = vpop.f32.mrf.mxu1 }
 0x1e4   :  { %v528_v30 = vpack.c.bf16 %v526_v28, %v526_v28  ;;  %v731_v29 = vld [vmem:[%s1316_s9] sm:$0x1] }
 0x1e6   :  { %696 = vmatprep.mubr.bf16.mxu0 %v528_v30  ;;  %v744_v30 = vld [vmem:[%s1316_s9 + $0x1] sm:$0x1] }
 0x1e7   :  { %697 = vmatmul.mubr.bf16.vlgmr.msra.gmra.mxu0 %v527_v31 }
 0x2a7   :  { %v888_v33 = vpop.f32.mrf.mxu0 }
 0x2a9   :  { %v889_v35 = vpop.f32.mrf.mxu0 }
 0x2aa   :  { %v890_v36 = vadd.f32 %v889_v35, %v888_v33  ;;  %v755_v35 = vld [vmem:[%s1316_s9 + $0x2] sm:$0x1] }
 0x2ab   :  { %v891_v38 = vpop.f32.mrf.mxu0 }
 0x2ac   :  { %v699_v39 = vadd.f32 %v890_v36, %v855_v34  ;;  %v766_v36 = vld [vmem:[%s1316_s9 + $0x3] sm:$0x1] }
 0x2ad   :  { %v892_v40 = vpop.f32.mrf.mxu0 }
 0x2ae   :  { %v704_v41 = vand.u32 2147483647, %v699_v39  ;;  %v778_v42 = vmul.f32 %v730_v37, %v699_v39  ;;  %v708_v61 = vmax.f32 %v699_v39, 0.0  ;;  %vm715_vm4 = vcmp.ge.f32.partialorder %v699_v39, 0.0 }
 0x2b0   :  { %v705_v43 = vsub.f32 0.0, %v704_v41  ;;  %v779_v44 = vsel %vm733_vm1, %v778_v42, 0.0 }
 0x2b1   :  { %v780_v45 = vrot.slane %v779_v44, 4 }
 0x2b2   :  { %v706_v46 = vmul.f32 1.442695, %v705_v43 }
 0x2b3   :  { %v781_v47 = vadd.f32 %v780_v45, %v779_v44 }
 0x2b4   :  { %990 = vpow2.f32 %v706_v46 }
 0x2b5   :  { %v782_v48 = vrot.slane %v781_v47, 2 }
 0x2b7   :  { %v783_v49 = vadd.f32 %v782_v48, %v781_v47 }
 0x2b9   :  { %v784_v50 = vrot.slane %v783_v49, 1 }
 0x2bb   :  { %v785_v52 = vadd.f32 %v784_v50, %v783_v49 }
 0x2bd   :  { %v786_v53 = vadd.f32 %v785_v52, %v777_v51 }
 0x2bf   :  { %787 = vst.msk [vmem:[%s1316_s9 + $0x4] sm:$0x1] %vm742_vm2, %v786_v53 }
 0x2c1   :  { %v991_v54 = vpop.eup %990 }
 0x2c2   :  { %v709_v55 = vadd.f32 1.0, %v991_v54 }
 0x2c4   :  { %992 = vlog2.f32 %v709_v55 }
 0x2c5   :  { %994 = vrcp.f32 %v709_v55 }
 0x2d1   :  { %v993_v59 = vpop.eup %992 }
 0x2d2   :  { %v995_v60 = vpop.eup %994  ;;  %v711_v0 = vmul.f32 0.6931472, %v993_v59 }
 0x2d3   :  { %v716_v1 = vmul.f32 %v995_v60, %v991_v54 }
 0x2d4   :  { %v712_v3 = vadd.f32 %v711_v0, %v708_v61 }
 0x2d5   :  { %v717_v4 = vsel %vm715_vm4, %v995_v60, %v716_v1 }
 0x2d6   :  { %v732_v5 = vsel %vm728_vm3, %v712_v3, 0.0  ;;  %v745_v6 = vsel %vm728_vm3, %v717_v4, 0.0  ;;  %v756_v7 = vmul.f32 %v729_v2, %v717_v4  ;;  %v767_v62 = vmul.f32 %v730_v37, %v717_v4 }
 0x2d7   :  { %v734_v63 = vsel %vm733_vm1, %v732_v5, 0.0  ;;  %v746_v8 = vsel %vm733_vm1, %v745_v6, 0.0 }
 0x2d8   :  { %v735_v9 = vrot.slane %v734_v63, 4  ;;  %v747_v10 = vrot.slane %v746_v8, 4  ;;  %v757_v11 = vsel %vm733_vm1, %v756_v7, 0.0  ;;  %v768_v12 = vsel %vm733_vm1, %v767_v62, 0.0 }
 0x2d9   :  { %v758_v13 = vrot.slane %v757_v11, 4  ;;  %v769_v14 = vrot.slane %v768_v12, 4 }
 0x2da   :  { %v736_v15 = vadd.f32 %v735_v9, %v734_v63  ;;  %v748_v16 = vadd.f32 %v747_v10, %v746_v8 }
 0x2db   :  { %v759_v17 = vadd.f32 %v758_v13, %v757_v11  ;;  %v770_v18 = vadd.f32 %v769_v14, %v768_v12 }
 0x2dc   :  { %v737_v19 = vrot.slane %v736_v15, 2  ;;  %v749_v20 = vrot.slane %v748_v16, 2 }
 0x2dd   :  { %v760_v21 = vrot.slane %v759_v17, 2  ;;  %v771_v22 = vrot.slane %v770_v18, 2 }
 0x2de   :  { %v738_v23 = vadd.f32 %v737_v19, %v736_v15  ;;  %v750_v24 = vadd.f32 %v749_v20, %v748_v16 }
 0x2df   :  { %v761_v25 = vadd.f32 %v760_v21, %v759_v17  ;;  %v772_v26 = vadd.f32 %v771_v22, %v770_v18 }
 0x2e0   :  { %v739_v27 = vrot.slane %v738_v23, 1  ;;  %v751_v28 = vrot.slane %v750_v24, 1 }
 0x2e1   :  { %v762_v31 = vrot.slane %v761_v25, 1  ;;  %v773_v32 = vrot.slane %v772_v26, 1 }
 0x2e2   :  { %v740_v33 = vadd.f32 %v739_v27, %v738_v23  ;;  %v752_v34 = vadd.f32 %v751_v28, %v750_v24 }
 0x2e3   :  { %v763_v37 = vadd.f32 %v762_v31, %v761_v25  ;;  %v774_v38 = vadd.f32 %v773_v32, %v772_v26 }
 0x2e4   :  { %v741_v39 = vadd.f32 %v740_v33, %v731_v29  ;;  %v753_v40 = vadd.f32 %v752_v34, %v744_v30 }
 0x2e5   :  { %v764_v41 = vadd.f32 %v763_v37, %v755_v35  ;;  %v775_v42 = vadd.f32 %v774_v38, %v766_v36 }
 0x2e6   :  { %743 = vst.msk [vmem:[%s1316_s9] sm:$0x1] %vm742_vm2, %v741_v39  ;;  %754 = vst.msk [vmem:[%s1316_s9 + $0x1] sm:$0x1] %vm742_vm2, %v753_v40 }
 0x2e7   :  { %765 = vst.msk [vmem:[%s1316_s9 + $0x2] sm:$0x1] %vm742_vm2, %v764_v41  ;;  %776 = vst.msk [vmem:[%s1316_s9 + $0x3] sm:$0x1] %vm742_vm2, %v775_v42 }
 0x2e8   :  { %792 = vsyncpa [#allocation3], 1 }
 0x2e9   :  { %793 = vsyncpa [#allocation5], 1 }
 0x2ea   :  { %794 = vsyncpa [#allocation8], 1 }

</bundles_post_ra>
